<compile_context>
chip_gen: v7x
topology: tpu7x:2x2x1
jax: 0.10.0
libtpu: 0.0.40
codegen_flags: <defaults>
</compile_context>

<pallas_src>
import jax
import jax.numpy as jnp
from jax.experimental import pallas as pl
from jax.experimental.pallas import tpu as pltpu


_LANE = 128
_MAX_LANE_WIDTH = 4096          # lane-dense slab width cap (multiple of 128)
_MIN_KERNEL_BYTES = 1 << 20     # below this, launch/DMA-setup overhead dominates


def _identity_kernel(x_ref, o_ref):
    # BaseModel.forward: outputs = self.model(x); the base class declares no
    # model, so the defined semantics is a pass-through copy.
    o_ref[...] = x_ref[...]


def _min_sublanes(dtype) -> int:
    # Minimum second-to-last tile dim: 8 for 32-bit, 16 for 16-bit, 32 for 8-bit.
    itemsize = jnp.dtype(dtype).itemsize
    return max(8, 8 * (4 // max(1, itemsize)))


def _target_block_bytes():
    """Generation-aware block size + explicit scoped-VMEM limit."""
    try:
        info = pltpu.get_tpu_info()
        vmem_bytes = int(getattr(info, "vmem_capacity_bytes", 64 << 20))
    except Exception:
        vmem_bytes = 64 << 20   # conservative fallback (v7x-sized)
    # Blocks are double-buffered for both input and output (4x block bytes live
    # at once); VMEM/16 leaves generous headroom on every generation:
    # 128 MiB (v5e/v6e) -> 8 MiB blocks, 64 MiB (v7x) -> 4 MiB blocks.
    target = max(1 << 20, min(8 << 20, vmem_bytes // 16))
    vmem_limit = int(min(vmem_bytes // 2, max(32 << 20, 6 * target)))
    return target, vmem_limit


def _largest_divisor(n, multiple_of, cap):
    """Largest d with d % multiple_of == 0, d <= cap, n % d == 0 (or None)."""
    cap = min(cap, n)
    d = (cap // multiple_of) * multiple_of
    while d >= multiple_of:
        if n % d == 0:
            return d
        d -= multiple_of
    return None


def _copy_2d(x2d, block_shape, grid, index_map, bytes_accessed, vmem_limit):
    return pl.pallas_call(
        _identity_kernel,
        out_shape=jax.ShapeDtypeStruct(x2d.shape, x2d.dtype),
        grid=grid,
        in_specs=[pl.BlockSpec(block_shape, index_map)],
        out_specs=pl.BlockSpec(block_shape, index_map),
        compiler_params=pltpu.CompilerParams(
            dimension_semantics=("parallel",),
            vmem_limit_bytes=vmem_limit,
        ),
        input_output_aliases={0: 0},
        cost_estimate=pl.CostEstimate(
            flops=0, transcendentals=0, bytes_accessed=bytes_accessed),
    )(x2d)


def base_model_forward(x, *, force_kernel=False):
    """Pallas implementation of BaseModel.forward (identity pass-through)."""
    # TODO(synk): `self.model` is undefined in BaseModel; subclasses (e.g. a
    # wav2vec2-style extractor) would replace the identity body with real compute.
    orig_shape = x.shape
    dtype = x.dtype
    itemsize = jnp.dtype(dtype).itemsize

    total = 1
    for d in orig_shape:
        total *= d
    total_bytes = total * itemsize

    # Dominant optimization (per review): an identity forward needs no kernel.
    # Only stream through VMEM when forced (testing) or when the tensor is big
    # enough that fixed launch/DMA-setup cost is fully amortized.
    if total == 0 or (not force_kernel and total_bytes < _MIN_KERNEL_BYTES):
        return x

    target_block_bytes, vmem_limit = _target_block_bytes()
    bytes_accessed = 2 * total_bytes

    if total % _LANE == 0:
        # Lane-aligned: wide lane-dense slab (rows, lane_width), unmasked stores.
        lane_width = _LANE
        while lane_width * 2 <= _MAX_LANE_WIDTH and total % (lane_width * 2) == 0:
            lane_width *= 2
        rows = total // lane_width
        sub = _min_sublanes(dtype)
        max_block_rows = max(
            sub, (target_block_bytes // (lane_width * itemsize)) // sub * sub)

        if rows <= max_block_rows:
            # Whole slab fits in one block: split into >=2 exact blocks when
            # possible so the "parallel" axis can shard across v7x's 2 TCs.
            block_rows = None
            if rows >= 2 * sub:
                block_rows = _largest_divisor(rows, sub, rows // 2)
            if block_rows is None:
                block_rows = rows            # full dim -> always legal
        else:
            # Prefer an exact tiling near the target block size (every step on
            # the wide unmasked-store path); fall back to a ragged last block.
            block_rows = (_largest_divisor(rows, sub, max_block_rows)
                          or max_block_rows)

        x2d = x.reshape(rows, lane_width)
        out2d = _copy_2d(
            x2d, (block_rows, lane_width), (pl.cdiv(rows, block_rows),),
            lambda i: (i, 0), bytes_accessed, vmem_limit)
    else:
        # Lane-unaligned element count: single (1, N) slab; the ragged tail is
        # handled by Pallas' partial-block masking -- no wrapper-side pad/slice
        # HBM passes.  (Rarely hit: small tensors take the bypass above.)
        max_block_cols = max(_LANE,
                             (target_block_bytes // itemsize) // _LANE * _LANE)
        x2d = x.reshape(1, total)
        if total <= max_block_cols:
            block_cols = total               # full dim -> legal block shape
        else:
            block_cols = max_block_cols      # multiple of 128; ragged last block
        out2d = _copy_2d(
            x2d, (1, block_cols), (pl.cdiv(total, block_cols),),
            lambda i: (0, i), bytes_accessed, vmem_limit)

    return out2d.reshape(orig_shape)


if __name__ == "__main__":
    key = jax.random.PRNGKey(0)
    # Small NCHW input consistent with a feature-extractor style forward.
    x = jax.random.normal(key, (2, 4, 16, 16), dtype=jnp.float32)

    # Fast path: identity bypass (the recommended production behavior).
    y_fast = jax.block_until_ready(base_model_forward(x))
    assert y_fast.shape == x.shape and y_fast.dtype == x.dtype
    assert bool(jnp.allclose(y_fast, x)), "bypass identity mismatch"

    # Kernel path, lane-aligned slab (forced so the Pallas kernel is exercised).
    y = jax.block_until_ready(base_model_forward(x, force_kernel=True))
    assert y.shape == x.shape and y.dtype == x.dtype
    assert bool(jnp.allclose(y, x)), "aligned kernel identity mismatch"

    # Kernel path, lane-unaligned element count (ragged handling in-kernel).
    x_odd = jax.random.normal(jax.random.PRNGKey(1), (3, 5, 7), dtype=jnp.float32)
    y_odd = jax.block_until_ready(base_model_forward(x_odd, force_kernel=True))
    assert y_odd.shape == x_odd.shape and y_odd.dtype == x_odd.dtype
    assert bool(jnp.allclose(y_odd, x_odd)), "unaligned kernel identity mismatch"

    print("KERNEL_OK")
</pallas_src>

<mosaic_0001>
module attributes {stable_mosaic.version = 11 : i64} {
  func.func @_identity_kernel(%arg0: i32, %arg1: memref<1x2048xf32, #tpu.memory_space<vmem>>, %arg2: memref<1x2048xf32, #tpu.memory_space<vmem>>) attributes {dimension_semantics = [#tpu.dimension_semantics<parallel>], iteration_bounds = array<i64: 1>, scalar_prefetch = 0 : i64, scratch_operands = 0 : i64, tpu.core_type = #tpu.core_type<tc>, window_params = [{transform_indices = @transform_0, window_bounds = array<i64: 1, 2048>}, {transform_indices = @transform_1, window_bounds = array<i64: 1, 2048>}]} {
    %c0 = arith.constant 0 : index
    %c0_0 = arith.constant 0 : index
    %0 = vector.load %arg1[%c0, %c0_0] : memref<1x2048xf32, #tpu.memory_space<vmem>>, vector<1x2048xf32>
    %c0_1 = arith.constant 0 : index
    %c0_2 = arith.constant 0 : index
    %1 = vector.load %arg2[%c0_1, %c0_2] : memref<1x2048xf32, #tpu.memory_space<vmem>>, vector<1x2048xf32>
    tpu.vector_store %arg2[%c0_1, %c0_2], %0 {strides = array<i32>} : memref<1x2048xf32, #tpu.memory_space<vmem>>, vector<1x2048xf32>,
    return
  }
  func.func @transform_0(%arg0: i32) -> (i32, i32) {
    %c0_i32 = arith.constant 0 : i32
    %c0_i32_0 = arith.constant 0 : i32
    return %arg0, %c0_i32 : i32, i32
  }
  func.func @transform_1(%arg0: i32) -> (i32, i32) {
    %c0_i32 = arith.constant 0 : i32
    %c0_i32_0 = arith.constant 0 : i32
    return %arg0, %c0_i32 : i32, i32
  }
}

</mosaic_0001>

<bundles_post_ra>
// kernel: tpu_custom_call.1
= control target key start
LH: loop header
LB: loop body
LE: loop exit
PB: predicated region body
PF: predicated region fallthrough
CT: control target
= control target key end

     0   :  { %6 = vsyncpa [#allocation3], 0  ;;  %s126_s0 = inlined_call_operand.hbm [shape: f32[1,2048], index: 0, kind: input, shape index: {}, may-alias: {0,1}]   ;;  %s127_s1 = inlined_call_operand.hbm [shape: f32[1,2048], index: 1, kind: output, shape index: {}, may-alias: {0,1}]  }
   0x1   :  { %7 = vsyncpa [#allocation4], 0  ;;  %s90_s6 = smov [#allocation2]   ;;  %s42_s10 = scalar_lea.hbm %s126_s0, 256 }
   0x2   :  { %s14_s7 = sshll.u32 %s90_s6, 4  ;;  %p43_p0 = scmp.ne.s32.totalorder %s126_s0, %s42_s10  ;;  %s15_s7 = int_to_ptr.vmem [resolvable:$true] %s14_s7 }
   0x3   :  { %p46_p1 = scmp.lt.u32.totalorder %s42_s10, %s126_s0 }
   0x5   :  { %p48_p2 = pnand %p46_p1, %p43_p0 }
   0x7   :  { %51 = shalt.err (!%p48_p2)
}
   0x8   :  { %s52_s15 = scalar_lea.vmem %s15_s7, 256  ;;  %p57_p4 = scmp.lt.s32.totalorder %s15_s7, %s15_s7 }
   0x9   :  { %p53_p3 = scmp.ne.s32.totalorder %s15_s7, %s52_s15  ;;  %p58_p5 = scmp.lt.s32.totalorder %s52_s15, %s52_s15 }
   0xb   :  { %p59_p6 = por %p58_p5, %p57_p4 }
   0xd   :  { %p60_p7 = pnand %p59_p6, %p53_p3 }
   0xf   :  { %63 = shalt.err (!%p60_p7)
}
  0x10   :  { %17 = dma.hbm_to_vmem [thread:$0]  %s126_s0, 256, %s15_s7, [#allocation3]  }
  0x11   :  { %86 = dma.done.wait [#allocation3], 256  }
  0x12   :  { %87 = vsyncadd [#allocation3], 4294967040  ;;  %s91_s18 = smov [#allocation5]   ;;  %v21_v0 = vld [vmem:[#allocation2] sm:$0xff]  ;;  %v22_v1 = vld [vmem:[#allocation2 + $0x8] sm:$0xff] }
  0x13   :  { %s31_s19 = sshll.u32 %s91_s18, 4  ;;  %23 = vst [vmem:[#allocation5] sm:$0xff] %v21_v0  ;;  %24 = vst [vmem:[#allocation5 + $0x8] sm:$0xff] %v22_v1  ;;  %s32_s19 = int_to_ptr.vmem [resolvable:$true] %s31_s19 }
  0x14   :  { %s64_s20 = scalar_lea.vmem %s32_s19, 256  ;;  %p69_p9 = scmp.lt.s32.totalorder %s32_s19, %s32_s19 }
  0x15   :  { %p65_p8 = scmp.ne.s32.totalorder %s32_s19, %s64_s20  ;;  %p70_p10 = scmp.lt.s32.totalorder %s64_s20, %s64_s20 }
  0x17   :  { %p71_p11 = por %p70_p10, %p69_p9 }
  0x19   :  { %p72_p12 = pnand %p71_p11, %p65_p8 }
  0x1b   :  { %75 = shalt.err (!%p72_p12)
}
  0x1c   :  { %s76_s0 = scalar_lea.hbm %s127_s1, 256 }
  0x1d   :  { %p77_p13 = scmp.ne.s32.totalorder %s127_s1, %s76_s0  ;;  %p80_p0 = scmp.lt.u32.totalorder %s76_s0, %s127_s1 }
  0x1f   :  { %p82_p1 = pnand %p80_p0, %p77_p13 }
  0x21   :  { %85 = shalt.err (!%p82_p1)
}
  0x22   :  { %34 = dma.vmem_to_hbm [thread:$0]  %s32_s19, 256, %s127_s1, [#allocation4]  }
  0x23   :  { %88 = dma.done.wait [#allocation4], 256  }
  0x24   :  { %89 = vsyncadd [#allocation4], 4294967040 }
  0x25   :  { %38 = vsyncpa [#allocation3], 1 }
  0x26   :  { %39 = vsyncpa [#allocation4], 1 }

</bundles_post_ra>
